<compile_context>
chip_gen: v7x
topology: tpu7x:2x2x1
jax: 0.10.0
libtpu: 0.0.40
codegen_flags: <defaults>
</compile_context>

<pallas_src>
import jax
import jax.numpy as jnp
from jax.experimental import pallas as pl
from jax.experimental.pallas import tpu as pltpu


_MIB = 1024 * 1024


# ------------------------------ helpers ------------------------------------ #
def _round_up(n, m):
    return ((n + m - 1) // m) * m


def _pad2(a, rows, cols):
    r, c = a.shape
    return jnp.pad(a, ((0, rows - r), (0, cols - c)))


def _vmem_limit_bytes():
    """Generation-aware VMEM budget: physical capacity minus headroom, capped.

    ~56 MiB on v7x (64 MiB/TC physical), ~100 MiB on v5e/v6e (128 MiB physical).
    """
    try:
        cap = pltpu.get_tpu_info().vmem_capacity_bytes
    except Exception:
        cap = 64 * _MIB
    return int(min(cap - 8 * _MIB, 100 * _MIB))


def _choose_row_tile(num_rows, tile_r):
    """Pick a 16-aligned row tile; prefer an even grid-step count (v7x 2 TCs)."""
    tr = max(16, min(_round_up(tile_r, 16), _round_up(num_rows, 16)))
    r_p = _round_up(num_rows, tr)
    steps = r_p // tr
    if steps > 1 and steps % 2 == 1 and tr >= 32:
        tr_half = max(16, _round_up(tr // 2, 16))
        r_p_half = _round_up(num_rows, tr_half)
        if (r_p_half // tr_half) % 2 == 0:
            tr, r_p = tr_half, r_p_half
    return tr, r_p


def _resident_spec(shape):
    """BlockSpec for a VMEM-resident (grid-invariant) operand, single-buffered."""
    return pl.BlockSpec(shape, lambda i: (0, 0), pipeline_mode=pl.Buffered(1))


# ----------------------------- Pallas kernel ------------------------------- #
def _box_head_kernel(x_ref, w6_ref, b6_ref, w7_ref, b7_ref, wp_ref, bp_ref,
                     feat_ref, pred_ref):
    """Fused FC6/FC7 feature extractor + fused cls/bbox predictor.

    x_ref:  [TILE_R, Din_pad]  bf16 activation tile (pipelined per grid step)
    w*_ref: bf16 weights, resident (single-buffered) in VMEM across grid steps
    b*_ref: f32 biases (1, N_pad)
    feat_ref: [TILE_R, H_pad]    bf16 (feature extractor output "x")
    pred_ref: [TILE_R, Pred_pad] f32  ([cls_logits | box_regression] slab)
    """
    x = x_ref[...].astype(w6_ref.dtype)
    # fc6: bf16 MXU matmul, f32 accumulation, f32 bias + ReLU.
    h6 = jnp.dot(x, w6_ref[...], preferred_element_type=jnp.float32)
    h6 = jnp.maximum(h6 + b6_ref[...], 0.0)
    # fc7
    h7 = jnp.dot(h6.astype(w7_ref.dtype), w7_ref[...],
                 preferred_element_type=jnp.float32)
    h7 = jnp.maximum(h7 + b7_ref[...], 0.0)
    feat_ref[...] = h7.astype(feat_ref.dtype)          # bf16 store (half vst)
    # fused predictor: one lane-dense, 128-aligned output slab, kept in f32.
    pred_ref[...] = (jnp.dot(h7.astype(wp_ref.dtype), wp_ref[...],
                             preferred_element_type=jnp.float32) + bp_ref[...])


# --------------------------- parameter prep (once) -------------------------- #
def prepare_box_head_params(params, compute_dtype=jnp.bfloat16):
    """Pad / concatenate / cast weights ONCE (weights are static at inference).

    Zero pads are exact for padded *columns* (zero weights/biases contribute
    nothing); padded ROI rows are sliced off by the wrapper.
    """
    din, hidden = params["w6"].shape
    n_cls = params["wc"].shape[1]
    n_box = params["wb"].shape[1]
    din_p = _round_up(din, 128)
    h_p = _round_up(hidden, 128)
    pred_p = _round_up(n_cls + n_box, 128)

    prepared = {
        "w6": _pad2(params["w6"], din_p, h_p).astype(compute_dtype),
        "b6": _pad2(params["b6"], 1, h_p).astype(jnp.float32),
        "w7": _pad2(params["w7"], h_p, h_p).astype(compute_dtype),
        "b7": _pad2(params["b7"], 1, h_p).astype(jnp.float32),
        "wp": _pad2(jnp.concatenate([params["wc"], params["wb"]], axis=1),
                    h_p, pred_p).astype(compute_dtype),
        "bp": _pad2(jnp.concatenate([params["bc"], params["bb"]], axis=1),
                    1, pred_p).astype(jnp.float32),
    }
    meta = dict(din=din, hidden=hidden, n_cls=n_cls, n_box=n_box,
                din_p=din_p, h_p=h_p, pred_p=pred_p,
                compute_dtype=compute_dtype)
    return prepared, meta


# ----------------------------- MLP wrapper ---------------------------------- #
def box_head_mlp(x_flat, prepared, meta, *, tile_r=256):
    """Run the fused box-head MLP Pallas kernel on flattened ROI features.

    x_flat is expected already in the compute dtype (producer-emitted bf16) so
    the only wrapper-side touch of the activations is the single pad pass.

    Returns (feature_x[R, hidden] bf16, class_logits[R, n_cls] f32,
             box_regression[R, n_box] f32).
    """
    R, din = x_flat.shape
    assert din == meta["din"], (din, meta["din"])
    din_p, h_p, pred_p = meta["din_p"], meta["h_p"], meta["pred_p"]
    hidden, n_cls, n_box = meta["hidden"], meta["n_cls"], meta["n_box"]
    cdt = meta["compute_dtype"]

    tr, r_p = _choose_row_tile(R, tile_r)
    grid = (r_p // tr,)

    # Single pad pass over bf16 activations (cast already fused into producer).
    xp = _pad2(x_flat.astype(cdt), r_p, din_p)

    itemsize = jnp.dtype(cdt).itemsize
    flops = int(2 * r_p * (din_p * h_p + h_p * h_p + h_p * pred_p))
    bytes_accessed = int(
        r_p * din_p * itemsize                                   # x (bf16)
        + (din_p * h_p + h_p * h_p + h_p * pred_p) * itemsize    # weights
        + (2 * h_p + pred_p) * 4                                 # biases (f32)
        + r_p * h_p * itemsize                                   # feat out bf16
        + r_p * pred_p * 4)                                      # pred out f32

    grid_spec = pltpu.PrefetchScalarGridSpec(
        num_scalar_prefetch=0,
        grid=grid,
        in_specs=[
            pl.BlockSpec((tr, din_p), lambda i: (i, 0)),   # x tile (pipelined)
            _resident_spec((din_p, h_p)),                  # w6 (single-buffered)
            _resident_spec((1, h_p)),                      # b6
            _resident_spec((h_p, h_p)),                    # w7
            _resident_spec((1, h_p)),                      # b7
            _resident_spec((h_p, pred_p)),                 # w_pred (cls|box)
            _resident_spec((1, pred_p)),                   # b_pred
        ],
        out_specs=(
            pl.BlockSpec((tr, h_p), lambda i: (i, 0)),     # feature x (bf16)
            pl.BlockSpec((tr, pred_p), lambda i: (i, 0)),  # fused predictions
        ),
    )

    feat_full, pred_full = pl.pallas_call(
        _box_head_kernel,
        out_shape=(
            jax.ShapeDtypeStruct((r_p, h_p), cdt),
            jax.ShapeDtypeStruct((r_p, pred_p), jnp.float32),
        ),
        grid_spec=grid_spec,
        compiler_params=pltpu.CompilerParams(
            dimension_semantics=("parallel",),     # v7x: 2 TCs split row tiles
            vmem_limit_bytes=_vmem_limit_bytes(),  # generation-aware budget
        ),
        cost_estimate=pl.CostEstimate(
            flops=flops, transcendentals=0, bytes_accessed=bytes_accessed),
    )(xp, prepared["w6"], prepared["b6"], prepared["w7"], prepared["b7"],
      prepared["wp"], prepared["bp"])

    # Slice the valid (unpadded) region back out; split fused predictor slab.
    x_out = feat_full[:R, :hidden]
    class_logits = pred_full[:R, :n_cls]
    box_regression = pred_full[:R, n_cls:n_cls + n_box]
    return x_out, class_logits, box_regression


# ------------------------------ JAX glue ------------------------------------ #
def roi_align(features, rois, pooled_size, spatial_scale):
    """Simple ROIAlign (sampling_ratio=1, one sample per bin center).

    features: [N, C, H, W] float32
    rois:     [R, 5] rows of (batch_idx, x1, y1, x2, y2) in input coordinates
    returns:  [R, C, P, P] float32
    """
    # TODO(synk): move this data-dependent bilinear gather into a Pallas
    # producer kernel (PrefetchScalarGridSpec scalar-prefetch of proposals +
    # manual make_async_copy gathers) that writes pooled features directly in
    # the padded lane-dense bf16 [R_pad, Din_pad] slab the MLP kernel expects,
    # eliminating the intermediate [R, C, P, P] f32 tensor in HBM.
    N, C, H, W = features.shape
    P = pooled_size

    def one_roi(roi):
        b = roi[0].astype(jnp.int32)
        x1 = roi[1] * spatial_scale
        y1 = roi[2] * spatial_scale
        x2 = roi[3] * spatial_scale
        y2 = roi[4] * spatial_scale
        roi_w = jnp.maximum(x2 - x1, 1.0)
        roi_h = jnp.maximum(y2 - y1, 1.0)
        bin_w = roi_w / P
        bin_h = roi_h / P
        ys = y1 + (jnp.arange(P, dtype=jnp.float32) + 0.5) * bin_h
        xs = x1 + (jnp.arange(P, dtype=jnp.float32) + 0.5) * bin_w
        yy, xx = jnp.meshgrid(ys, xs, indexing="ij")          # [P, P]
        fmap = features[b]                                     # [C, H, W]

        def bilinear(y, x):
            y = jnp.clip(y, 0.0, H - 1.0)
            x = jnp.clip(x, 0.0, W - 1.0)
            y0 = jnp.floor(y).astype(jnp.int32)
            x0 = jnp.floor(x).astype(jnp.int32)
            y1i = jnp.minimum(y0 + 1, H - 1)
            x1i = jnp.minimum(x0 + 1, W - 1)
            ly = y - y0.astype(jnp.float32)
            lx = x - x0.astype(jnp.float32)
            v00 = fmap[:, y0, x0]
            v01 = fmap[:, y0, x1i]
            v10 = fmap[:, y1i, x0]
            v11 = fmap[:, y1i, x1i]
            return (v00 * (1 - ly) * (1 - lx) + v01 * (1 - ly) * lx +
                    v10 * ly * (1 - lx) + v11 * ly * lx)       # [C]

        vals = jax.vmap(jax.vmap(bilinear))(yy, xx)            # [P, P, C]
        return jnp.transpose(vals, (2, 0, 1))                  # [C, P, P]

    return jax.vmap(one_roi)(rois)


def make_params(key, in_dim, hidden_dim, num_classes):
    """Deterministic synthetic parameters matching the box head shapes."""
    ks = jax.random.split(key, 8)
    s = 0.05
    return {
        "w6": s * jax.random.normal(ks[0], (in_dim, hidden_dim), jnp.float32),
        "b6": s * jax.random.normal(ks[1], (1, hidden_dim), jnp.float32),
        "w7": s * jax.random.normal(ks[2], (hidden_dim, hidden_dim), jnp.float32),
        "b7": s * jax.random.normal(ks[3], (1, hidden_dim), jnp.float32),
        "wc": s * jax.random.normal(ks[4], (hidden_dim, num_classes), jnp.float32),
        "bc": s * jax.random.normal(ks[5], (1, num_classes), jnp.float32),
        "wb": s * jax.random.normal(ks[6], (hidden_dim, num_classes * 4), jnp.float32),
        "bb": s * jax.random.normal(ks[7], (1, num_classes * 4), jnp.float32),
    }


def roi_box_head_forward(features, proposals, prepared, meta,
                         pooled_size, spatial_scale):
    """Inference forward of ROIBoxHead:
       x = feature_extractor(features, proposals)
       class_logits, box_regression = predictor(x)
       result = post_processor(...)
       returns (x, result, {}, x, None)
    """
    pooled = roi_align(features, proposals, pooled_size, spatial_scale)  # [R,C,P,P]
    R = pooled.shape[0]
    # Cast to the MXU compute dtype in the producer epilogue (XLA fuses the
    # reshape + convert with the ROIAlign output) so the kernel reads bf16.
    x_flat = pooled.reshape(R, -1).astype(meta["compute_dtype"])         # [R,C*P*P]
    x, class_logits, box_regression = box_head_mlp(x_flat, prepared, meta)
    # TODO(synk): post_processor (box decoding + per-class NMS) has no clean
    # Pallas equivalent; return raw predictor outputs as the "result".
    result = (class_logits, box_regression)
    return (x, result, {}, x, None)


# --------------------------------- main ------------------------------------- #
if __name__ == "__main__":
    key = jax.random.PRNGKey(0)
    k_feat, k_box, k_param = jax.random.split(key, 3)

    # Small shapes: batch=2, channels=4, spatial=16x16, pooled 4x4,
    # 8 proposals per image (16 total), hidden=32, num_classes=8.
    N, C, H, W = 2, 4, 16, 16
    P = 4
    R_PER_IMG = 8
    HIDDEN = 32
    NUM_CLASSES = 8
    SPATIAL_SCALE = 1.0

    features = jax.random.normal(k_feat, (N, C, H, W), jnp.float32)

    # Proposals: (batch_idx, x1, y1, x2, y2) with x2>x1, y2>y1 inside the map.
    corners = jax.random.uniform(k_box, (N * R_PER_IMG, 4),
                                 minval=1.0, maxval=float(W - 2))
    x1 = jnp.minimum(corners[:, 0], corners[:, 2])
    x2 = jnp.maximum(corners[:, 0], corners[:, 2]) + 1.0
    y1 = jnp.minimum(corners[:, 1], corners[:, 3])
    y2 = jnp.maximum(corners[:, 1], corners[:, 3]) + 1.0
    batch_idx = jnp.repeat(jnp.arange(N, dtype=jnp.float32), R_PER_IMG)
    proposals = jnp.stack([batch_idx, x1, y1, x2, y2], axis=1)           # [16, 5]

    in_dim = C * P * P
    params = make_params(k_param, in_dim, HIDDEN, NUM_CLASSES)

    # One-time weight prep (pad / concat / cast) outside the per-call path.
    prepared, meta = prepare_box_head_params(params)
    prepared = jax.tree_util.tree_map(jax.block_until_ready, prepared)

    x, result, losses, x2_out, extra = roi_box_head_forward(
        features, proposals, prepared, meta, P, SPATIAL_SCALE)
    jax.block_until_ready(x)
    jax.block_until_ready(result)

    assert x.shape == (N * R_PER_IMG, HIDDEN)
    assert result[0].shape == (N * R_PER_IMG, NUM_CLASSES)
    assert result[1].shape == (N * R_PER_IMG, NUM_CLASSES * 4)
    assert losses == {}
    assert jnp.all(jnp.isfinite(x.astype(jnp.float32)))
    assert jnp.all(jnp.isfinite(result[0])) and jnp.all(jnp.isfinite(result[1]))
    print("KERNEL_OK")
</pallas_src>

<mosaic_0001>
module attributes {stable_mosaic.version = 11 : i64} {
  func.func @_box_head_kernel(%arg0: i32, %arg1: memref<16x128xbf16, #tpu.memory_space<vmem>>, %arg2: memref<128x128xbf16, #tpu.memory_space<vmem>>, %arg3: memref<1x128xf32, #tpu.memory_space<vmem>>, %arg4: memref<128x128xbf16, #tpu.memory_space<vmem>>, %arg5: memref<1x128xf32, #tpu.memory_space<vmem>>, %arg6: memref<128x128xbf16, #tpu.memory_space<vmem>>, %arg7: memref<1x128xf32, #tpu.memory_space<vmem>>, %arg8: memref<16x128xbf16, #tpu.memory_space<vmem>>, %arg9: memref<16x128xf32, #tpu.memory_space<vmem>>) attributes {dimension_semantics = [#tpu.dimension_semantics<parallel>], iteration_bounds = array<i64: 1>, scalar_prefetch = 0 : i64, scratch_operands = 0 : i64, tpu.core_type = #tpu.core_type<tc>, window_params = [{transform_indices = @transform_0, window_bounds = array<i64: 16, 128>}, {pipeline_mode = #tpu.pipeline_mode<synchronous>, transform_indices = @transform_1, window_bounds = array<i64: 128, 128>}, {pipeline_mode = #tpu.pipeline_mode<synchronous>, transform_indices = @transform_2, window_bounds = array<i64: 1, 128>}, {pipeline_mode = #tpu.pipeline_mode<synchronous>, transform_indices = @transform_3, window_bounds = array<i64: 128, 128>}, {pipeline_mode = #tpu.pipeline_mode<synchronous>, transform_indices = @transform_4, window_bounds = array<i64: 1, 128>}, {pipeline_mode = #tpu.pipeline_mode<synchronous>, transform_indices = @transform_5, window_bounds = array<i64: 128, 128>}, {pipeline_mode = #tpu.pipeline_mode<synchronous>, transform_indices = @transform_6, window_bounds = array<i64: 1, 128>}, {transform_indices = @transform_7, window_bounds = array<i64: 16, 128>}, {transform_indices = @transform_8, window_bounds = array<i64: 16, 128>}]} {
    %c0 = arith.constant 0 : index
    %c0_0 = arith.constant 0 : index
    %0 = vector.load %arg1[%c0, %c0_0] : memref<16x128xbf16, #tpu.memory_space<vmem>>, vector<16x128xbf16>
    %c0_1 = arith.constant 0 : index
    %c0_2 = arith.constant 0 : index
    %1 = vector.load %arg2[%c0_1, %c0_2] : memref<128x128xbf16, #tpu.memory_space<vmem>>, vector<128x128xbf16>
    %cst = arith.constant dense<0.000000e+00> : vector<16x128xf32>
    %2 = tpu.matmul %0, %1, %cst {dimension_numbers = #tpu.dot_dimension_numbers<[1], [0], [0], [1], [0, 0, 1, 1], [], []>} : vector<16x128xbf16>, vector<128x128xbf16>, vector<16x128xf32> -> vector<16x128xf32>
    %c0_3 = arith.constant 0 : index
    %c0_4 = arith.constant 0 : index
    %3 = vector.load %arg3[%c0_3, %c0_4] : memref<1x128xf32, #tpu.memory_space<vmem>>, vector<1x128xf32>
    %4 = vector.broadcast %3 : vector<1x128xf32> to vector<16x128xf32>
    %5 = arith.addf %2, %4 : vector<16x128xf32>
    %cst_5 = arith.constant 0.000000e+00 : f32
    %6 = vector.broadcast %cst_5 : f32 to vector<16x128xf32>
    %7 = arith.maximumf %5, %6 : vector<16x128xf32>
    %8 = arith.truncf %7 : vector<16x128xf32> to vector<16x128xbf16>
    %c0_6 = arith.constant 0 : index
    %c0_7 = arith.constant 0 : index
    %9 = vector.load %arg4[%c0_6, %c0_7] : memref<128x128xbf16, #tpu.memory_space<vmem>>, vector<128x128xbf16>
    %cst_8 = arith.constant dense<0.000000e+00> : vector<16x128xf32>
    %10 = tpu.matmul %8, %9, %cst_8 {dimension_numbers = #tpu.dot_dimension_numbers<[1], [0], [0], [1], [0, 0, 1, 1], [], []>} : vector<16x128xbf16>, vector<128x128xbf16>, vector<16x128xf32> -> vector<16x128xf32>
    %c0_9 = arith.constant 0 : index
    %c0_10 = arith.constant 0 : index
    %11 = vector.load %arg5[%c0_9, %c0_10] : memref<1x128xf32, #tpu.memory_space<vmem>>, vector<1x128xf32>
    %12 = vector.broadcast %11 : vector<1x128xf32> to vector<16x128xf32>
    %13 = arith.addf %10, %12 : vector<16x128xf32>
    %cst_11 = arith.constant 0.000000e+00 : f32
    %14 = vector.broadcast %cst_11 : f32 to vector<16x128xf32>
    %15 = arith.maximumf %13, %14 : vector<16x128xf32>
    %16 = arith.truncf %15 : vector<16x128xf32> to vector<16x128xbf16>
    %c0_12 = arith.constant 0 : index
    %c0_13 = arith.constant 0 : index
    %17 = vector.load %arg8[%c0_12, %c0_13] : memref<16x128xbf16, #tpu.memory_space<vmem>>, vector<16x128xbf16>
    tpu.vector_store %arg8[%c0_12, %c0_13], %16 {strides = array<i32>} : memref<16x128xbf16, #tpu.memory_space<vmem>>, vector<16x128xbf16>,
    %18 = arith.truncf %15 : vector<16x128xf32> to vector<16x128xbf16>
    %c0_14 = arith.constant 0 : index
    %c0_15 = arith.constant 0 : index
    %19 = vector.load %arg6[%c0_14, %c0_15] : memref<128x128xbf16, #tpu.memory_space<vmem>>, vector<128x128xbf16>
    %cst_16 = arith.constant dense<0.000000e+00> : vector<16x128xf32>
    %20 = tpu.matmul %18, %19, %cst_16 {dimension_numbers = #tpu.dot_dimension_numbers<[1], [0], [0], [1], [0, 0, 1, 1], [], []>} : vector<16x128xbf16>, vector<128x128xbf16>, vector<16x128xf32> -> vector<16x128xf32>
    %c0_17 = arith.constant 0 : index
    %c0_18 = arith.constant 0 : index
    %21 = vector.load %arg7[%c0_17, %c0_18] : memref<1x128xf32, #tpu.memory_space<vmem>>, vector<1x128xf32>
    %22 = vector.broadcast %21 : vector<1x128xf32> to vector<16x128xf32>
    %23 = arith.addf %20, %22 : vector<16x128xf32>
    %c0_19 = arith.constant 0 : index
    %c0_20 = arith.constant 0 : index
    %24 = vector.load %arg9[%c0_19, %c0_20] : memref<16x128xf32, #tpu.memory_space<vmem>>, vector<16x128xf32>
    tpu.vector_store %arg9[%c0_19, %c0_20], %23 {strides = array<i32>} : memref<16x128xf32, #tpu.memory_space<vmem>>, vector<16x128xf32>,
    return
  }
  func.func @transform_0(%arg0: i32) -> (i32, i32) {
    %c0_i32 = arith.constant 0 : i32
    %c0_i32_0 = arith.constant 0 : i32
    return %arg0, %c0_i32 : i32, i32
  }
  func.func @transform_1(%arg0: i32) -> (i32, i32) {
    %c0_i32 = arith.constant 0 : i32
    %c0_i32_0 = arith.constant 0 : i32
    %c0_i32_1 = arith.constant 0 : i32
    return %c0_i32, %c0_i32_0 : i32, i32
  }
  func.func @transform_2(%arg0: i32) -> (i32, i32) {
    %c0_i32 = arith.constant 0 : i32
    %c0_i32_0 = arith.constant 0 : i32
    %c0_i32_1 = arith.constant 0 : i32
    return %c0_i32, %c0_i32_0 : i32, i32
  }
  func.func @transform_3(%arg0: i32) -> (i32, i32) {
    %c0_i32 = arith.constant 0 : i32
    %c0_i32_0 = arith.constant 0 : i32
    %c0_i32_1 = arith.constant 0 : i32
    return %c0_i32, %c0_i32_0 : i32, i32
  }
  func.func @transform_4(%arg0: i32) -> (i32, i32) {
    %c0_i32 = arith.constant 0 : i32
    %c0_i32_0 = arith.constant 0 : i32
    %c0_i32_1 = arith.constant 0 : i32
    return %c0_i32, %c0_i32_0 : i32, i32
  }
  func.func @transform_5(%arg0: i32) -> (i32, i32) {
    %c0_i32 = arith.constant 0 : i32
    %c0_i32_0 = arith.constant 0 : i32
    %c0_i32_1 = arith.constant 0 : i32
    return %c0_i32, %c0_i32_0 : i32, i32
  }
  func.func @transform_6(%arg0: i32) -> (i32, i32) {
    %c0_i32 = arith.constant 0 : i32
    %c0_i32_0 = arith.constant 0 : i32
    %c0_i32_1 = arith.constant 0 : i32
    return %c0_i32, %c0_i32_0 : i32, i32
  }
  func.func @transform_7(%arg0: i32) -> (i32, i32) {
    %c0_i32 = arith.constant 0 : i32
    %c0_i32_0 = arith.constant 0 : i32
    return %arg0, %c0_i32 : i32, i32
  }
  func.func @transform_8(%arg0: i32) -> (i32, i32) {
    %c0_i32 = arith.constant 0 : i32
    %c0_i32_0 = arith.constant 0 : i32
    return %arg0, %c0_i32 : i32, i32
  }
}

</mosaic_0001>

<bundles_post_ra>
// kernel: tpu_custom_call.1
= control target key start
LH: loop header
LB: loop body
LE: loop exit
PB: predicated region body
PF: predicated region fallthrough
CT: control target
= control target key end

     0   :  { %14 = vsyncpa [#allocation3], 0  ;;  %s982_s0 = inlined_call_operand.hbm [shape: bf16[16,128], index: 0, kind: input, shape index: {}]   ;;  %s983_s1 = inlined_call_operand.hbm [shape: bf16[128,128], index: 1, kind: input, shape index: {}]   ;;  %s984_s2 = inlined_call_operand.vmem [shape: f32[1,128], index: 2, kind: input, shape index: {}]   ;;  %s985_s3 = inlined_call_operand.hbm [shape: bf16[128,128], index: 3, kind: input, shape index: {}]   ;;  %s986_s4 = inlined_call_operand.vmem [shape: f32[1,128], index: 4, kind: input, shape index: {}]   ;;  %s987_s5 = inlined_call_operand.hbm [shape: bf16[128,128], index: 5, kind: input, shape index: {}]   ;;  %s988_s6 = inlined_call_operand.vmem [shape: f32[1,128], index: 6, kind: input, shape index: {}]   ;;  %s989_s7 = inlined_call_operand.hbm [shape: bf16[16,128], index: 7, kind: output, shape index: {0}]   ;;  %s990_s8 = inlined_call_operand.hbm [shape: f32[16,128], index: 8, kind: output, shape index: {1}]  }
   0x1   :  { %15 = vsyncpa [#allocation6], 0 }
   0x2   :  { %16 = vsyncpa [#allocation9], 0 }
   0x3   :  { %17 = vsyncpa [#allocation4], 0 }
   0x4   :  { %18 = vsyncpa [#allocation12], 0  ;;  %s785_s27 = smov [#allocation5]   ;;  %s786_s29 = smov [#allocation2]  }
   0x5   :  { %s36_s28 = sshll.u32 %s785_s27, 4  ;;  %s24_s30 = sshll.u32 %s786_s29, 4  ;;  %s37_s28 = int_to_ptr.vmem [resolvable:$true] %s36_s28  ;;  %s842_s30 = int_to_ptr.vmem [resolvable:$true] %s24_s30 }
   0x6   :  { %s643_s11 = scalar_lea.hbm %s983_s1, 1024 }
   0x7   :  { %p644_p0 = scmp.ne.s32.totalorder %s983_s1, %s643_s11  ;;  %p647_p1 = scmp.lt.u32.totalorder %s643_s11, %s983_s1 }
   0x9   :  { %p649_p2 = pnand %p647_p1, %p644_p0 }
   0xb   :  { %652 = shalt.err (!%p649_p2)
}
   0xc   :  { %s653_s16 = scalar_lea.vmem %s37_s28, 1024  ;;  %p658_p4 = scmp.lt.s32.totalorder %s37_s28, %s37_s28 }
   0xd   :  { %p654_p3 = scmp.ne.s32.totalorder %s37_s28, %s653_s16  ;;  %p659_p5 = scmp.lt.s32.totalorder %s653_s16, %s653_s16 }
   0xf   :  { %p660_p6 = por %p659_p5, %p658_p4 }
  0x11   :  { %p661_p7 = pnand %p660_p6, %p654_p3 }
  0x13   :  { %664 = shalt.err (!%p661_p7)
}
  0x14   :  { %s787_s17 = smov 64   ;;  %s788_s18 = smov 4  }
  0x15   :  { %42 = dma.hbm_to_vmem [thread:$0]  %s983_s1, 1024, %s37_s28, [#allocation6], %s787_s17, %s787_s17, %s788_s18  }
  0x16   :  { %s665_s23 = scalar_lea.hbm %s982_s0, 128 }
  0x17   :  { %p666_p8 = scmp.ne.s32.totalorder %s982_s0, %s665_s23  ;;  %p669_p9 = scmp.lt.u32.totalorder %s665_s23, %s982_s0 }
  0x19   :  { %p671_p10 = pnand %p669_p9, %p666_p8 }
  0x1b   :  { %674 = shalt.err (!%p671_p10)
}
  0x1c   :  { %s675_s29 = scalar_lea.vmem %s842_s30, 128  ;;  %p680_p12 = scmp.lt.s32.totalorder %s842_s30, %s842_s30 }
  0x1d   :  { %p676_p11 = scmp.ne.s32.totalorder %s842_s30, %s675_s29  ;;  %p681_p13 = scmp.lt.s32.totalorder %s675_s29, %s675_s29 }
  0x1f   :  { %p682_p0 = por %p681_p13, %p680_p12 }
  0x21   :  { %p683_p1 = pnand %p682_p0, %p676_p11 }
  0x23   :  { %686 = shalt.err (!%p683_p1)
}
  0x24   :  { %30 = dma.hbm_to_vmem [thread:$0]  %s982_s0, 128, %s842_s30, [#allocation3], %s787_s17, %s787_s17, %s788_s18  }
  0x25   :  { %s789_s9 = smov [#allocation7]   ;;  %s790_s11 = smov [#allocation8]  }
  0x26   :  { %s50_s10 = sshll.u32 %s789_s9, 4  ;;  %s64_s12 = sshll.u32 %s790_s11, 4  ;;  %s51_s10 = int_to_ptr.vmem [resolvable:$true] %s50_s10  ;;  %s879_s12 = int_to_ptr.vmem [resolvable:$true] %s64_s12 }
  0x27   :  { %s687_s15 = scalar_lea.hbm %s985_s3, 1024 }
  0x28   :  { %p688_p2 = scmp.ne.s32.totalorder %s985_s3, %s687_s15  ;;  %p691_p3 = scmp.lt.u32.totalorder %s687_s15, %s985_s3 }
  0x2a   :  { %p693_p4 = pnand %p691_p3, %p688_p2 }
  0x2c   :  { %696 = shalt.err (!%p693_p4)
}
  0x2d   :  { %s697_s0 = scalar_lea.vmem %s51_s10, 1024  ;;  %p702_p6 = scmp.lt.s32.totalorder %s51_s10, %s51_s10 }
  0x2e   :  { %p698_p5 = scmp.ne.s32.totalorder %s51_s10, %s697_s0  ;;  %p703_p7 = scmp.lt.s32.totalorder %s697_s0, %s697_s0 }
  0x30   :  { %p704_p8 = por %p703_p7, %p702_p6 }
  0x32   :  { %p705_p9 = pnand %p704_p8, %p698_p5 }
  0x34   :  { %708 = shalt.err (!%p705_p9)
}
  0x35   :  { %56 = dma.hbm_to_vmem [thread:$0]  %s985_s3, 1024, %s51_s10, [#allocation6], %s787_s17, %s787_s17, %s788_s18  }
  0x36   :  { %s709_s25 = scalar_lea.hbm %s987_s5, 1024 }
  0x37   :  { %p710_p10 = scmp.ne.s32.totalorder %s987_s5, %s709_s25  ;;  %p713_p11 = scmp.lt.u32.totalorder %s709_s25, %s987_s5 }
  0x39   :  { %p715_p12 = pnand %p713_p11, %p710_p10 }
  0x3b   :  { %718 = shalt.err (!%p715_p12)
}
  0x3c   :  { %s719_s28 = scalar_lea.vmem %s879_s12, 1024  ;;  %p724_p0 = scmp.lt.s32.totalorder %s879_s12, %s879_s12 }
  0x3d   :  { %p720_p13 = scmp.ne.s32.totalorder %s879_s12, %s719_s28  ;;  %p725_p1 = scmp.lt.s32.totalorder %s719_s28, %s719_s28 }
  0x3f   :  { %p726_p2 = por %p725_p1, %p724_p0 }
  0x41   :  { %p727_p3 = pnand %p726_p2, %p720_p13 }
  0x43   :  { %730 = shalt.err (!%p727_p3)
}
  0x44   :  { %70 = dma.hbm_to_vmem [thread:$0]  %s987_s5, 1024, %s879_s12, [#allocation9], %s787_s17, %s787_s17, %s788_s18  }
  0x45   :  { %775 = dma.done.wait [#allocation3], 128  }
  0x46   :  { %776 = vsyncadd [#allocation3], 4294967168 }
  0x47   :  { %777 = dma.done.wait [#allocation6], 2048  }
  0x48   :  { %778 = vsyncadd [#allocation6], 4294965248 }
  0x49   :  { %779 = dma.done.wait [#allocation9], 1024  }
  0x4a   :  { %780 = vsyncadd [#allocation9], 4294966272  ;;  %v791_v0 = vmov 0.0   ;;  %vm792_vm0 = vmmov 0   ;;  %v618_v1 = vld [vmem:[#allocation5] sm:$0xff]   ;;  %v619_v2 = vld [vmem:[#allocation5 + $0x8] sm:$0xff]  }
  0x4b   :  { %546 = vmatprep.subr.bf16.mxu0 %v791_v0  ;;  %562 = vmatprep.mubr.msk.bf16.mxu0 %vm792_vm0, %v791_v0  ;;  %v620_v3 = vld [vmem:[#allocation5 + $0x10] sm:$0xff]   ;;  %v627_v4 = vld [vmem:[#allocation7] sm:$0xff]   ;;  %v621_v5 = vld [vmem:[#allocation5 + $0x18] sm:$0xff]  }
  0x4c   :  { %566 = vmatprep.subr.bf16.mxu1 %v791_v0  ;;  %582 = vmatprep.mubr.msk.bf16.mxu1 %vm792_vm0, %v791_v0  ;;  %v628_v6 = vld [vmem:[#allocation7 + $0x8] sm:$0xff]   ;;  %v622_v7 = vld [vmem:[#allocation5 + $0x20] sm:$0xff]   ;;  %v629_v8 = vld [vmem:[#allocation7 + $0x10] sm:$0xff]  }
  0x4d   :  { %547 = vmatpush3.bf16.msra.mxu0 %v618_v1  ;;  %567 = vmatpush3.bf16.msra.mxu1 %v627_v4  ;;  %v623_v9 = vld [vmem:[#allocation5 + $0x28] sm:$0xff]   ;;  %v630_v10 = vld [vmem:[#allocation7 + $0x18] sm:$0xff]   ;;  %v624_v11 = vld [vmem:[#allocation5 + $0x30] sm:$0xff]  }
  0x4e   :  { %548 = vmatprep.subr.bf16.mxu0 %v791_v0  ;;  %568 = vmatprep.subr.bf16.mxu1 %v791_v0  ;;  %v631_v12 = vld [vmem:[#allocation7 + $0x20] sm:$0xff]   ;;  %v625_v13 = vld [vmem:[#allocation5 + $0x38] sm:$0xff]   ;;  %v632_v14 = vld [vmem:[#allocation7 + $0x28] sm:$0xff]  }
  0x4f   :  { %v626_v15 = vld [vmem:[#allocation2] sm:$0xff]   ;;  %v633_v16 = vld [vmem:[#allocation7 + $0x30] sm:$0xff]   ;;  %v635_v18 = vld [vmem:[#allocation8] sm:$0xff]  }
  0x50   :  { %v634_v17 = vld [vmem:[#allocation7 + $0x38] sm:$0xff]   ;;  %v636_v19 = vld [vmem:[#allocation8 + $0x8] sm:$0xff]   ;;  %v637_v20 = vld [vmem:[#allocation8 + $0x10] sm:$0xff]  }
  0x51   :  { %549 = vmatpush3.bf16.msra.mxu0 %v619_v2  ;;  %569 = vmatpush3.bf16.msra.mxu1 %v628_v6  ;;  %v638_v21 = vld [vmem:[#allocation8 + $0x18] sm:$0xff]   ;;  %v639_v22 = vld [vmem:[#allocation8 + $0x20] sm:$0xff]   ;;  %v640_v23 = vld [vmem:[#allocation8 + $0x28] sm:$0xff]  }
  0x52   :  { %550 = vmatprep.subr.bf16.mxu0 %v791_v0  ;;  %570 = vmatprep.subr.bf16.mxu1 %v791_v0  ;;  %v482_v24 = vld [vmem:[%s984_s2] ss:$0 sm:$0xff]  ;;  %v641_v34 = vld [vmem:[#allocation8 + $0x30] sm:$0xff]   ;;  %s793_s2 = smov [#allocation10]  }
  0x53   :  { %v642_v35 = vld [vmem:[#allocation8 + $0x38] sm:$0xff]   ;;  %s452_s13 = sshll.u32 %s793_s2, 4  ;;  %s453_s13 = int_to_ptr.vmem [resolvable:$true] %s452_s13 }
  0x54   :  { %v492_v36 = vld [vmem:[%s986_s4] ss:$0 sm:$0xff]  ;;  %s731_s14 = scalar_lea.vmem %s453_s13, 128  ;;  %p736_p5 = scmp.lt.s32.totalorder %s453_s13, %s453_s13 }
  0x55   :  { %551 = vmatpush3.bf16.msra.mxu0 %v620_v3  ;;  %571 = vmatpush3.bf16.msra.mxu1 %v629_v8  ;;  %p732_p4 = scmp.ne.s32.totalorder %s453_s13, %s731_s14  ;;  %p737_p6 = scmp.lt.s32.totalorder %s731_s14, %s731_s14 }
  0x56   :  { %552 = vmatprep.subr.bf16.mxu0 %v791_v0  ;;  %572 = vmatprep.subr.bf16.mxu1 %v791_v0 }
  0x57   :  { %p738_p7 = por %p737_p6, %p736_p5 }
  0x59   :  { %553 = vmatpush3.bf16.msra.mxu0 %v621_v5  ;;  %573 = vmatpush3.bf16.msra.mxu1 %v630_v10  ;;  %p739_p8 = pnand %p738_p7, %p732_p4 }
  0x5a   :  { %554 = vmatprep.subr.bf16.mxu0 %v791_v0  ;;  %574 = vmatprep.subr.bf16.mxu1 %v791_v0 }
  0x5d   :  { %555 = vmatpush3.bf16.msra.mxu0 %v622_v7  ;;  %575 = vmatpush3.bf16.msra.mxu1 %v631_v12 }
  0x5e   :  { %556 = vmatprep.subr.bf16.mxu0 %v791_v0  ;;  %576 = vmatprep.subr.bf16.mxu1 %v791_v0 }
  0x61   :  { %557 = vmatpush3.bf16.msra.mxu0 %v623_v9  ;;  %577 = vmatpush3.bf16.msra.mxu1 %v632_v14 }
  0x62   :  { %558 = vmatprep.subr.bf16.mxu0 %v791_v0  ;;  %578 = vmatprep.subr.bf16.mxu1 %v791_v0 }
  0x65   :  { %559 = vmatpush3.bf16.msra.mxu0 %v624_v11  ;;  %579 = vmatpush3.bf16.msra.mxu1 %v633_v16 }
  0x66   :  { %560 = vmatprep.subr.bf16.mxu0 %v791_v0  ;;  %580 = vmatprep.subr.bf16.mxu1 %v791_v0 }
  0x69   :  { %561 = vmatpush3.bf16.msra.mxu0 %v625_v13  ;;  %581 = vmatpush3.bf16.msra.mxu1 %v634_v17 }
  0x6a   :  { %586 = vmatprep.subr.bf16.mxu0 %v791_v0 }
  0x6c   :  { %563 = vmatmul.mubr.bf16.vlgmr.msra.gmra.mrb[0].mxu0 %v626_v15 }
  0x6d   :  { %602 = vmatprep.mubr.msk.bf16.mxu0 %vm792_vm0, %v791_v0  ;;  %587 = vmatpush3.bf16.msra.mxu0 %v635_v18 }
  0x6e   :  { %588 = vmatprep.subr.bf16.mxu0 %v791_v0 }
  0x71   :  { %589 = vmatpush3.bf16.msra.mxu0 %v636_v19 }
  0x72   :  { %590 = vmatprep.subr.bf16.mxu0 %v791_v0 }
  0x75   :  { %591 = vmatpush3.bf16.msra.mxu0 %v637_v20 }
  0x76   :  { %592 = vmatprep.subr.bf16.mxu0 %v791_v0 }
  0x79   :  { %593 = vmatpush3.bf16.msra.mxu0 %v638_v21 }
  0x7a   :  { %594 = vmatprep.subr.bf16.mxu0 %v791_v0 }
  0x7d   :  { %595 = vmatpush3.bf16.msra.mxu0 %v639_v22 }
  0x7e   :  { %596 = vmatprep.subr.bf16.mxu0 %v791_v0 }
  0x81   :  { %597 = vmatpush3.bf16.msra.mxu0 %v640_v23 }
  0x82   :  { %598 = vmatprep.subr.bf16.mxu0 %v791_v0 }
  0x85   :  { %599 = vmatpush3.bf16.msra.mxu0 %v641_v34 }
  0x86   :  { %600 = vmatprep.subr.bf16.mxu0 %v791_v0 }
  0x89   :  { %601 = vmatpush3.bf16.msra.mxu0 %v642_v35 }
 0x13f   :  { %v199_v25 = vpop.f32.mrb[0].mxu0 }
 0x140   :  { %v200_v26 = vadd.f32 %v482_v24, %v199_v25  ;;  %v564_v27 = vpop.f32.mrb[1].mxu0 }
 0x141   :  { %v202_v28 = vpop.f32.mrb[2].mxu0 }
 0x142   :  { %v203_v29 = vadd.f32 %v482_v24, %v202_v28  ;;  %v565_v30 = vpop.f32.mrb[3].mxu0  ;;  %v206_v31 = vmax.f32 %v200_v26, 0.0 }
 0x144   :  { %v207_v32 = vmax.f32 %v203_v29, 0.0 }
 0x146   :  { %v208_v33 = vpack.c.bf16 %v207_v32, %v206_v31 }
 0x148   :  { %583 = vmatmul.mubr.bf16.vlgmr.msra.gmra.mrb[0].mxu1 %v208_v33 }
 0x21b   :  { %v314_v37 = vpop.f32.mrb[0].mxu1 }
 0x21c   :  { %v315_v38 = vadd.f32 %v492_v36, %v314_v37  ;;  %v584_v39 = vpop.f32.mrb[1].mxu1 }
 0x21d   :  { %v317_v40 = vpop.f32.mrb[2].mxu1 }
 0x21e   :  { %v318_v41 = vadd.f32 %v492_v36, %v317_v40  ;;  %v585_v42 = vpop.f32.mrb[3].mxu1  ;;  %v321_v43 = vmax.f32 %v315_v38, 0.0 }
 0x220   :  { %v322_v44 = vmax.f32 %v318_v41, 0.0 }
 0x222   :  { %v323_v45 = vpack.c.bf16 %v322_v44, %v321_v43 }
 0x224   :  { %518 = vst [vmem:[#allocation10] sm:$0xff] %v323_v45   ;;  %603 = vmatmul.mubr.bf16.vlgmr.msra.gmra.mrb[4].mxu0 %v323_v45 }
 0x225   :  { %742 = shalt.err (!%p739_p8)
}
 0x226   :  { %s743_s16 = scalar_lea.hbm %s989_s7, 128 }
 0x227   :  { %p744_p9 = scmp.ne.s32.totalorder %s989_s7, %s743_s16  ;;  %p747_p10 = scmp.lt.u32.totalorder %s743_s16, %s989_s7 }
 0x229   :  { %p749_p11 = pnand %p747_p10, %p744_p9 }
 0x22b   :  { %752 = shalt.err (!%p749_p11)
}
 0x22c   :  { %458 = dma.vmem_to_hbm [thread:$0]  %s453_s13, 128, %s989_s7, [#allocation4], %s787_s17, %s787_s17, %s788_s18  }
 0x22d   :  { %v503_v46 = vld [vmem:[%s988_s6] ss:$0 sm:$0xff]  ;;  %s794_s25 = smov [#allocation11]  }
 0x22e   :  { %s464_s26 = sshll.u32 %s794_s25, 4  ;;  %s465_s26 = int_to_ptr.vmem [resolvable:$true] %s464_s26 }
 0x22f   :  { %s753_s27 = scalar_lea.vmem %s465_s26, 256  ;;  %p758_p13 = scmp.lt.s32.totalorder %s465_s26, %s465_s26 }
 0x230   :  { %p754_p12 = scmp.ne.s32.totalorder %s465_s26, %s753_s27  ;;  %p759_p0 = scmp.lt.s32.totalorder %s753_s27, %s753_s27 }
 0x232   :  { %p760_p1 = por %p759_p0, %p758_p13 }
 0x234   :  { %p761_p2 = pnand %p760_p1, %p754_p12 }
 0x2f7   :  { %v438_v47 = vpop.f32.mrb[4].mxu0 }
 0x2f8   :  { %v439_v48 = vadd.f32 %v503_v46, %v438_v47  ;;  %v604_v49 = vpop.f32.mrb[5].mxu0 }
 0x2f9   :  { %v441_v50 = vpop.f32.mrb[6].mxu0 }
 0x2fa   :  { %445 = vst [vmem:[#allocation11] sm:$0xff] %v439_v48  ;;  %v442_v51 = vadd.f32 %v503_v46, %v441_v50  ;;  %v605_v52 = vpop.f32.mrb[7].mxu0 }
 0x2fc   :  { %446 = vst [vmem:[#allocation11 + $0x8] sm:$0xff] %v442_v51 }
 0x2fd   :  { %764 = shalt.err (!%p761_p2)
}
 0x2fe   :  { %s765_s17 = scalar_lea.hbm %s990_s8, 256 }
 0x2ff   :  { %p766_p3 = scmp.ne.s32.totalorder %s990_s8, %s765_s17  ;;  %p769_p4 = scmp.lt.u32.totalorder %s765_s17, %s990_s8 }
 0x301   :  { %p771_p5 = pnand %p769_p4, %p766_p3 }
 0x303   :  { %774 = shalt.err (!%p771_p5)
}
 0x304   :  { %s795_s3 = smov 128   ;;  %s796_s9 = smov 8  }
 0x305   :  { %470 = dma.vmem_to_hbm [thread:$0]  %s465_s26, 256, %s990_s8, [#allocation12], %s795_s3, %s795_s3, %s796_s9  }
 0x306   :  { %781 = dma.done.wait [#allocation4], 128  }
 0x307   :  { %782 = vsyncadd [#allocation4], 4294967168 }
 0x308   :  { %783 = dma.done.wait [#allocation12], 256  }
 0x309   :  { %784 = vsyncadd [#allocation12], 4294967040 }
 0x30a   :  { %477 = vsyncpa [#allocation3], 1 }
 0x30b   :  { %478 = vsyncpa [#allocation6], 1 }
 0x30c   :  { %479 = vsyncpa [#allocation9], 1 }
 0x30d   :  { %480 = vsyncpa [#allocation4], 1 }
 0x30e   :  { %481 = vsyncpa [#allocation12], 1 }

</bundles_post_ra>
